<compile_context>
chip_gen: v7x
topology: tpu7x:2x2x1
jax: 0.10.0
libtpu: 0.0.40
codegen_flags: <defaults>
</compile_context>

<pallas_src>
import math

import jax
import jax.numpy as jnp
from jax.experimental import pallas as pl
from jax.experimental.pallas import tpu as pltpu


def _norm_kernel(x_ref, ms_ref, o_ref):
    # x_ref:  (block_rows, L) tile of the lane-dense flattened input
    # ms_ref: (2, L) resident f32 operand: row 0 = mean, row 1 = 1/std
    # o_ref:  (block_rows, L) output tile
    mean = ms_ref[0:1, :]      # (1, L) f32
    inv_std = ms_ref[1:2, :]   # (1, L) f32
    x = x_ref[...].astype(jnp.float32)
    o_ref[...] = ((x - mean) * inv_std).astype(o_ref.dtype)


def _lane_dense_divisor(rows: int, c: int, max_l: int):
    """Largest L = k*c with k | rows, L % 128 == 0, L <= max_l; None if absent."""
    best = None
    k_max = min(max(1, max_l // c), rows)
    for k in range(1, k_max + 1):
        if rows % k == 0 and (k * c) % 128 == 0:
            best = k * c
    return best


def _widest_exact_divisor(rows: int, c: int, max_l: int) -> int:
    """Largest L = k*c with k | rows and L <= max_l (no lane-density requirement)."""
    best = c
    k_max = min(max(1, max_l // c), rows)
    for k in range(1, k_max + 1):
        if rows % k == 0:
            best = max(best, k * c)
    return best


def normalization(x: jax.Array, mean: jax.Array, std: jax.Array,
                  *, max_lane_width: int = 4096,
                  target_block_bytes: int = 8 * 1024 * 1024) -> jax.Array:
    """z-score normalize an NHWC tensor with per-channel mean/std."""
    orig_shape = x.shape
    c = orig_shape[-1]
    assert mean.shape == (c,) and std.shape == (c,)

    rows = 1
    for d in orig_shape[:-1]:
        rows *= d
    total = rows * c

    # --- choose a lane-dense 2D layout --------------------------------------
    lane_w = _lane_dense_divisor(rows, c, max_lane_width)
    pad = 0
    if lane_w is None:
        # No exact lane-dense factorization: pad the flat length once up to a
        # multiple of lcm(C, 128) so every store stays a full unmasked vst.
        lcm = c * (128 // math.gcd(c, 128))
        if lcm <= 32768:
            lane_w = lcm
            pad = (-total) % lane_w
        else:
            # Pathological channel count: give up on lane density (rare).
            lane_w = _widest_exact_divisor(rows, c, max_lane_width)

    padded_total = total + pad
    rows_2d = padded_total // lane_w

    x_flat = x.reshape(-1)
    if pad:
        x_flat = jnp.pad(x_flat, (0, pad))
    x2 = x_flat.reshape(rows_2d, lane_w)

    # Per-channel mean and 1/std in f32, tiled to lane width, packed into one
    # (2, L) resident operand.  (std == 0 -> inf, matching PyTorch.)
    reps = lane_w // c
    mean_f = mean.astype(jnp.float32)
    inv_std_f = 1.0 / std.astype(jnp.float32)
    ms = jnp.stack([jnp.tile(mean_f, reps), jnp.tile(inv_std_f, reps)], axis=0)

    # --- block sizing --------------------------------------------------------
    itemsize = jnp.dtype(x.dtype).itemsize
    row_bytes = lane_w * itemsize
    ms_bytes = 2 * lane_w * 4

    br = max(1, target_block_bytes // row_bytes)
    if br >= rows_2d or rows_2d <= 8:
        block_rows = rows_2d
    else:
        block_rows = min(max(8, (br // 8) * 8), rows_2d)

    # Give v7x's two TensorCores at least 2 grid steps when the tensor allows.
    if block_rows >= rows_2d and rows_2d >= 16:
        half = (rows_2d + 1) // 2
        block_rows = min(((half + 7) // 8) * 8, rows_2d)

    # Chip-aware VMEM ceiling (v7x has only 64 MiB physical VMEM per core).
    try:
        vmem_cap = int(getattr(pltpu.get_tpu_info(), "vmem_capacity_bytes",
                               64 << 20))
    except Exception:
        vmem_cap = 64 << 20
    vmem_ceiling = max(8 << 20, vmem_cap - (12 << 20))

    # Double-buffered input + output blocks + resident stats + headroom.
    overhead = 2 * ms_bytes + (2 << 20)
    while block_rows > 8 and 4 * block_rows * row_bytes + overhead > vmem_ceiling:
        block_rows = max(8, ((block_rows // 2 + 7) // 8) * 8)

    block_bytes = block_rows * row_bytes
    vmem_limit = int(min(max(4 * block_bytes + overhead, 4 << 20), vmem_ceiling))

    grid = (pl.cdiv(rows_2d, block_rows),)

    out = pl.pallas_call(
        _norm_kernel,
        out_shape=jax.ShapeDtypeStruct((rows_2d, lane_w), x.dtype),
        grid_spec=pltpu.PrefetchScalarGridSpec(
            num_scalar_prefetch=0,
            grid=grid,
            in_specs=[
                pl.BlockSpec((block_rows, lane_w), lambda i: (i, 0)),
                pl.BlockSpec((2, lane_w), lambda i: (0, 0)),
            ],
            out_specs=pl.BlockSpec((block_rows, lane_w), lambda i: (i, 0)),
        ),
        compiler_params=pltpu.CompilerParams(
            dimension_semantics=("parallel",),
            vmem_limit_bytes=vmem_limit),
    )(x2, ms)

    out_flat = out.reshape(-1)
    if pad:
        out_flat = out_flat[:total]
    return out_flat.reshape(orig_shape)


if __name__ == "__main__":
    key = jax.random.PRNGKey(0)
    kx, km, ks, kx2, km2, ks2 = jax.random.split(key, 6)

    # --- test 1: exact lane-dense path (NHWC, C=8) ---------------------------
    N, H, W, C = 2, 16, 16, 8
    x = jax.random.normal(kx, (N, H, W, C), dtype=jnp.float32) * 3.0 + 1.5
    mean = jax.random.normal(km, (C,), dtype=jnp.float32)
    std = jax.random.uniform(ks, (C,), dtype=jnp.float32, minval=0.5, maxval=2.0)

    y = normalization(x, mean, std)
    jax.block_until_ready(y)
    ref = (x - mean.reshape(1, 1, 1, C)) / std.reshape(1, 1, 1, C)
    assert y.shape == x.shape and y.dtype == x.dtype
    assert jnp.allclose(y, ref, atol=1e-6, rtol=1e-6)

    # --- test 2: padded lane-dense path (C=3, no 128-factor in rows) --------
    N2, H2, W2, C2 = 2, 15, 15, 3
    x2 = jax.random.normal(kx2, (N2, H2, W2, C2), dtype=jnp.float32) * 2.0 - 0.5
    mean2 = jax.random.normal(km2, (C2,), dtype=jnp.float32)
    std2 = jax.random.uniform(ks2, (C2,), dtype=jnp.float32, minval=0.5, maxval=2.0)

    y2 = normalization(x2, mean2, std2)
    jax.block_until_ready(y2)
    ref2 = (x2 - mean2.reshape(1, 1, 1, C2)) / std2.reshape(1, 1, 1, C2)
    assert y2.shape == x2.shape and y2.dtype == x2.dtype
    assert jnp.allclose(y2, ref2, atol=1e-6, rtol=1e-6)

    print("KERNEL_OK")
</pallas_src>

<mosaic_0001>
module attributes {stable_mosaic.version = 11 : i64} {
  func.func @_norm_kernel(%arg0: i32, %arg1: memref<1x4096xf32, #tpu.memory_space<vmem>>, %arg2: memref<2x4096xf32, #tpu.memory_space<vmem>>, %arg3: memref<1x4096xf32, #tpu.memory_space<vmem>>) attributes {dimension_semantics = [#tpu.dimension_semantics<parallel>], iteration_bounds = array<i64: 1>, scalar_prefetch = 0 : i64, scratch_operands = 0 : i64, tpu.core_type = #tpu.core_type<tc>, window_params = [{transform_indices = @transform_0, window_bounds = array<i64: 1, 4096>}, {pipeline_mode = #tpu.pipeline_mode<synchronous>, transform_indices = @transform_1, window_bounds = array<i64: 2, 4096>}, {transform_indices = @transform_2, window_bounds = array<i64: 1, 4096>}]} {
    %c0 = arith.constant 0 : index
    %c0_0 = arith.constant 0 : index
    %0 = vector.load %arg2[%c0, %c0_0] : memref<2x4096xf32, #tpu.memory_space<vmem>>, vector<1x4096xf32>
    %c1 = arith.constant 1 : index
    %c0_1 = arith.constant 0 : index
    %1 = vector.load %arg2[%c1, %c0_1] : memref<2x4096xf32, #tpu.memory_space<vmem>>, vector<1x4096xf32>
    %c0_2 = arith.constant 0 : index
    %c0_3 = arith.constant 0 : index
    %2 = vector.load %arg1[%c0_2, %c0_3] : memref<1x4096xf32, #tpu.memory_space<vmem>>, vector<1x4096xf32>
    %3 = arith.subf %2, %0 : vector<1x4096xf32>
    %4 = arith.mulf %3, %1 : vector<1x4096xf32>
    %c0_4 = arith.constant 0 : index
    %c0_5 = arith.constant 0 : index
    %5 = vector.load %arg3[%c0_4, %c0_5] : memref<1x4096xf32, #tpu.memory_space<vmem>>, vector<1x4096xf32>
    tpu.vector_store %arg3[%c0_4, %c0_5], %4 {strides = array<i32>} : memref<1x4096xf32, #tpu.memory_space<vmem>>, vector<1x4096xf32>,
    return
  }
  func.func @transform_0(%arg0: i32) -> (i32, i32) {
    %c0_i32 = arith.constant 0 : i32
    %c0_i32_0 = arith.constant 0 : i32
    return %arg0, %c0_i32 : i32, i32
  }
  func.func @transform_1(%arg0: i32) -> (i32, i32) {
    %c0_i32 = arith.constant 0 : i32
    %c0_i32_0 = arith.constant 0 : i32
    %c0_i32_1 = arith.constant 0 : i32
    return %c0_i32, %c0_i32_0 : i32, i32
  }
  func.func @transform_2(%arg0: i32) -> (i32, i32) {
    %c0_i32 = arith.constant 0 : i32
    %c0_i32_0 = arith.constant 0 : i32
    return %arg0, %c0_i32 : i32, i32
  }
}

</mosaic_0001>

<bundles_post_ra>
// kernel: tpu_custom_call.1
= control target key start
LH: loop header
LB: loop body
LE: loop exit
PB: predicated region body
PF: predicated region fallthrough
CT: control target
= control target key end

     0   :  { %7 = vsyncpa [#allocation3], 0  ;;  %s212_s0 = inlined_call_operand.hbm [shape: f32[1,4096], index: 0, kind: input, shape index: {}]   ;;  %s213_s1 = inlined_call_operand.hbm [shape: f32[2,4096], index: 1, kind: input, shape index: {}]   ;;  %s214_s2 = inlined_call_operand.hbm [shape: f32[1,4096], index: 2, kind: output, shape index: {}]  }
   0x1   :  { %8 = vsyncpa [#allocation6], 0 }
   0x2   :  { %9 = vsyncpa [#allocation4], 0  ;;  %s158_s9 = smov [#allocation2]   ;;  %s159_s11 = smov [#allocation5]  }
   0x3   :  { %s16_s10 = sshll.u32 %s158_s9, 4  ;;  %s26_s12 = sshll.u32 %s159_s11, 4  ;;  %s17_s10 = int_to_ptr.vmem [resolvable:$true] %s16_s10  ;;  %s27_s12 = int_to_ptr.vmem [resolvable:$true] %s26_s12 }
   0x4   :  { %s86_s15 = scalar_lea.hbm %s212_s0, 512 }
   0x5   :  { %p87_p0 = scmp.ne.s32.totalorder %s212_s0, %s86_s15  ;;  %p90_p1 = scmp.lt.u32.totalorder %s86_s15, %s212_s0 }
   0x7   :  { %p92_p2 = pnand %p90_p1, %p87_p0 }
   0x9   :  { %95 = shalt.err (!%p92_p2)
}
   0xa   :  { %s96_s20 = scalar_lea.vmem %s17_s10, 512  ;;  %p101_p4 = scmp.lt.s32.totalorder %s17_s10, %s17_s10 }
   0xb   :  { %p97_p3 = scmp.ne.s32.totalorder %s17_s10, %s96_s20  ;;  %p102_p5 = scmp.lt.s32.totalorder %s96_s20, %s96_s20 }
   0xd   :  { %p103_p6 = por %p102_p5, %p101_p4 }
   0xf   :  { %p104_p7 = pnand %p103_p6, %p97_p3 }
  0x11   :  { %107 = shalt.err (!%p104_p7)
}
  0x12   :  { %19 = dma.hbm_to_vmem [thread:$0]  %s212_s0, 512, %s17_s10, [#allocation3]  }
  0x13   :  { %s108_s25 = scalar_lea.hbm %s213_s1, 1024 }
  0x14   :  { %p109_p8 = scmp.ne.s32.totalorder %s213_s1, %s108_s25  ;;  %p112_p9 = scmp.lt.u32.totalorder %s108_s25, %s213_s1 }
  0x16   :  { %p114_p10 = pnand %p112_p9, %p109_p8 }
  0x18   :  { %117 = shalt.err (!%p114_p10)
}
  0x19   :  { %s118_s30 = scalar_lea.vmem %s27_s12, 1024  ;;  %p123_p12 = scmp.lt.s32.totalorder %s27_s12, %s27_s12 }
  0x1a   :  { %p119_p11 = scmp.ne.s32.totalorder %s27_s12, %s118_s30  ;;  %p124_p13 = scmp.lt.s32.totalorder %s118_s30, %s118_s30 }
  0x1c   :  { %p125_p0 = por %p124_p13, %p123_p12 }
  0x1e   :  { %p126_p1 = pnand %p125_p0, %p119_p11 }
  0x20   :  { %129 = shalt.err (!%p126_p1)
}
  0x21   :  { %29 = dma.hbm_to_vmem [thread:$0]  %s213_s1, 1024, %s27_s12, [#allocation6]  }
  0x22   :  { %152 = dma.done.wait [#allocation3], 512  }
  0x23   :  { %153 = vsyncadd [#allocation3], 4294966784 }
  0x24   :  { %154 = dma.done.wait [#allocation6], 1024  }
  0x25   :  { %155 = vsyncadd [#allocation6], 4294966272  ;;  %v36_v0 = vld [vmem:[#allocation5] ss:$2 sm:$0xff]  ;;  %v44_v1 = vld [vmem:[#allocation5 + $0x1] ss:$2 sm:$0xff] }
  0x26   :  { %v51_v2 = vld [vmem:[#allocation2] sm:$0xff]  ;;  %v38_v4 = vld [vmem:[#allocation5 + $0x10] ss:$2 sm:$0xff]  ;;  %v46_v5 = vld [vmem:[#allocation5 + $0x11] ss:$2 sm:$0xff]  ;;  %s160_s1 = smov [#allocation7]  }
  0x27   :  { %v55_v3 = vsub.f32 %v51_v2, %v36_v0  ;;  %v52_v6 = vld [vmem:[#allocation2 + $0x8] sm:$0xff]  ;;  %v53_v10 = vld [vmem:[#allocation2 + $0x10] sm:$0xff]  ;;  %v54_v15 = vld [vmem:[#allocation2 + $0x18] sm:$0xff]  ;;  %s73_s4 = sshll.u32 %s160_s1, 4  ;;  %s74_s4 = int_to_ptr.vmem [resolvable:$true] %s73_s4 }
  0x28   :  { %v56_v7 = vsub.f32 %v52_v6, %v38_v4  ;;  %v40_v8 = vld [vmem:[#allocation5 + $0x20] ss:$2 sm:$0xff]  ;;  %v48_v9 = vld [vmem:[#allocation5 + $0x21] ss:$2 sm:$0xff]  ;;  %v42_v13 = vld [vmem:[#allocation5 + $0x30] ss:$2 sm:$0xff]  ;;  %p135_p3 = scmp.lt.s32.totalorder %s74_s4, %s74_s4 }
  0x29   :  { %v59_v11 = vmul.f32 %v55_v3, %v44_v1  ;;  %v57_v12 = vsub.f32 %v53_v10, %v40_v8  ;;  %v50_v14 = vld [vmem:[#allocation5 + $0x31] ss:$2 sm:$0xff]  ;;  %v58_v17 = vsub.f32 %v54_v15, %v42_v13  ;;  %s130_s5 = scalar_lea.vmem %s74_s4, 512 }
  0x2a   :  { %v60_v16 = vmul.f32 %v56_v7, %v46_v5  ;;  %p131_p2 = scmp.ne.s32.totalorder %s74_s4, %s130_s5  ;;  %p136_p4 = scmp.lt.s32.totalorder %s130_s5, %s130_s5 }
  0x2b   :  { %63 = vst [vmem:[#allocation7] sm:$0xff] %v59_v11  ;;  %v61_v18 = vmul.f32 %v57_v12, %v48_v9  ;;  %v62_v19 = vmul.f32 %v58_v17, %v50_v14 }
  0x2c   :  { %64 = vst [vmem:[#allocation7 + $0x8] sm:$0xff] %v60_v16  ;;  %p137_p5 = por %p136_p4, %p135_p3 }
  0x2d   :  { %65 = vst [vmem:[#allocation7 + $0x10] sm:$0xff] %v61_v18  ;;  %66 = vst [vmem:[#allocation7 + $0x18] sm:$0xff] %v62_v19 }
  0x2e   :  { %p138_p6 = pnand %p137_p5, %p131_p2 }
  0x30   :  { %141 = shalt.err (!%p138_p6)
}
  0x31   :  { %s142_s8 = scalar_lea.hbm %s214_s2, 512 }
  0x32   :  { %p143_p7 = scmp.ne.s32.totalorder %s214_s2, %s142_s8  ;;  %p146_p8 = scmp.lt.u32.totalorder %s142_s8, %s214_s2 }
  0x34   :  { %p148_p9 = pnand %p146_p8, %p143_p7 }
  0x36   :  { %151 = shalt.err (!%p148_p9)
}
  0x37   :  { %76 = dma.vmem_to_hbm [thread:$0]  %s74_s4, 512, %s214_s2, [#allocation4]  }
  0x38   :  { %156 = dma.done.wait [#allocation4], 512  }
  0x39   :  { %157 = vsyncadd [#allocation4], 4294966784 }
  0x3a   :  { %80 = vsyncpa [#allocation3], 1 }
  0x3b   :  { %81 = vsyncpa [#allocation6], 1 }
  0x3c   :  { %82 = vsyncpa [#allocation4], 1 }

</bundles_post_ra>
